<compile_context>
chip_gen: v5e
topology: v5e:2x2
jax: 0.10.0
libtpu: 0.0.40
codegen_flags: <defaults>
</compile_context>

<pallas_src>
import jax
import jax.numpy as jnp
from jax.experimental import pallas as pl
from jax.experimental.pallas import tpu as pltpu

# ---- problem sizes (derived from the PyTorch script) ------------------------
sentences = ['i like cat', 'i love Riemann', 'i hate milk']
word_list = ' '.join(sentences).split()
vocab = sorted(set(word_list))          # sorted for determinism
word2idx = {w: i for i, w in enumerate(vocab)}

n_class = len(vocab)                    # 7
n_hidden = 5
seq_len = 2                             # first two words of each sentence
batch = len(sentences)                  # 3


def _round_up(x, m):
    return ((x + m - 1) // m) * m


# ---- Pallas wrapper + kernel -------------------------------------------------
def textrnn_forward(X, h_0, w_ih, w_hh, b_ih, b_hh, w_fc, b_fc):
    """X: (batch, seq_len, n_class); h_0: (1, batch, n_hidden) -> (batch, n_class)."""
    B, T, C = X.shape
    H = w_ih.shape[0]

    Bp = _round_up(B, 8)                # sublane-aligned batch
    Hp = _round_up(H, 8)                # 8-row-aligned weight sections
    Cp = _round_up(C, 128)              # lane-dense fc output

    f32 = jnp.float32
    Xf = X.astype(f32)
    h0 = h_0[0].astype(f32)                                  # (B, H)
    w_ihf = w_ih.astype(f32)
    w_hhf = w_hh.astype(f32)
    b_rnn = (b_ih + b_hh).astype(f32)
    w_fcf = w_fc.astype(f32)
    b_fcf = b_fc.astype(f32)

    # --- wrapper-side precompute (off the kernel's serial critical path) -----
    # Input projection for all time steps (independent of the recurrence).
    ih = jnp.einsum('btc,hc->tbh', Xf, w_ihf) + b_rnn        # (T, B, H)
    # Fold the initial hidden state's recurrent contribution into step 0.
    ih = ih.at[0].add(h0 @ w_hhf.T)
    ih = jnp.pad(ih, ((0, 0), (0, Bp - B), (0, 0)))          # (T, Bp, H)

    # --- pack everything into ONE zero-padded (rows, Cp) f32 slab (one DMA) --
    ih_blk = jnp.pad(ih.reshape(T * Bp, H), ((0, 0), (0, Cp - H)))       # (T*Bp, Cp)
    whh_blk = jnp.pad(w_hhf.T, ((0, Hp - H), (0, Cp - H)))               # (Hp,   Cp)
    wfc_blk = jnp.pad(w_fcf.T, ((0, Hp - H), (0, Cp - C)))               # (Hp,   Cp)
    bfc_blk = jnp.broadcast_to(jnp.pad(b_fcf, (0, Cp - C)), (Bp, Cp))    # (Bp,   Cp)
    slab = jnp.concatenate([ih_blk, whh_blk, wfc_blk, bfc_blk], axis=0)  # (T*Bp+2*Hp+Bp, Cp)

    off_whh = T * Bp                    # 8-row aligned section offsets
    off_wfc = off_whh + Hp
    off_bfc = off_wfc + Hp

    def kernel(slab_ref, out_ref):
        # Static, tile-boundary-friendly carve-outs of the packed slab.
        w_hh_t = slab_ref[off_whh:off_whh + H, 0:H]          # (H, H)
        w_fc_t = slab_ref[off_wfc:off_wfc + H, :]            # (H, Cp)
        bias_fc = slab_ref[off_bfc:off_bfc + Bp, :]          # (Bp, Cp)

        # Step 0: ih[0] already carries h_0 @ W_hh^T + b_ih + b_hh.
        h = jnp.tanh(slab_ref[0:Bp, 0:H])                    # (Bp, H)

        # Remaining steps: exactly one dependent matmul + tanh per step.
        for t in range(1, T):
            hh = jnp.dot(h, w_hh_t, preferred_element_type=jnp.float32)
            h = jnp.tanh(slab_ref[t * Bp:(t + 1) * Bp, 0:H] + hh)

        # fc: lane-dense (Bp, Cp) store; bias pre-broadcast (plain vadd).
        out_ref[...] = (jnp.dot(h, w_fc_t, preferred_element_type=jnp.float32)
                        + bias_fc)

    out_p = pl.pallas_call(
        kernel,
        out_shape=jax.ShapeDtypeStruct((Bp, Cp), jnp.float32),
        in_specs=[pl.BlockSpec(memory_space=pltpu.MemorySpace.VMEM)],
        out_specs=pl.BlockSpec(memory_space=pltpu.MemorySpace.VMEM),
    )(slab)

    return out_p[:B, :C]


# ---- pure-JAX reference (sanity check) ---------------------------------------
def textrnn_ref(X, h_0, w_ih, w_hh, b_ih, b_hh, w_fc, b_fc):
    x_tm = jnp.transpose(X, (1, 0, 2))
    h = h_0[0]
    for t in range(x_tm.shape[0]):
        h = jnp.tanh(x_tm[t] @ w_ih.T + b_ih + h @ w_hh.T + b_hh)
    return h @ w_fc.T + b_fc


if __name__ == "__main__":
    key = jax.random.PRNGKey(0)
    k1, k2, k3, k4, k5, k6 = jax.random.split(key, 6)

    # deterministic parameter init (shapes follow nn.RNN / nn.Linear)
    bound = 1.0 / jnp.sqrt(n_hidden)
    w_ih = jax.random.uniform(k1, (n_hidden, n_class), jnp.float32, -bound, bound)
    w_hh = jax.random.uniform(k2, (n_hidden, n_hidden), jnp.float32, -bound, bound)
    b_ih = jax.random.uniform(k3, (n_hidden,), jnp.float32, -bound, bound)
    b_hh = jax.random.uniform(k4, (n_hidden,), jnp.float32, -bound, bound)
    w_fc = jax.random.uniform(k5, (n_class, n_hidden), jnp.float32, -bound, bound)
    b_fc = jax.random.uniform(k6, (n_class,), jnp.float32, -bound, bound)

    # one-hot inputs: first two words of each sentence -> (batch, seq_len, n_class)
    idx = jnp.array([[word2idx[w] for w in sen.split()[:seq_len]]
                     for sen in sentences], dtype=jnp.int32)
    X = jax.nn.one_hot(idx, n_class, dtype=jnp.float32)      # (3, 2, 7)
    h_0 = jnp.zeros((1, batch, n_hidden), jnp.float32)

    out = textrnn_forward(X, h_0, w_ih, w_hh, b_ih, b_hh, w_fc, b_fc)
    out = jax.block_until_ready(out)

    ref = textrnn_ref(X, h_0, w_ih, w_hh, b_ih, b_hh, w_fc, b_fc)
    assert out.shape == (batch, n_class)
    assert jnp.allclose(out, ref, atol=1e-5, rtol=1e-5)

    print("KERNEL_OK")
</pallas_src>

<mosaic_0001>
module attributes {stable_mosaic.version = 11 : i64} {
  func.func @kernel(%arg0: memref<40x128xf32, #tpu.memory_space<vmem>>, %arg1: memref<8x128xf32, #tpu.memory_space<vmem>>) attributes {dimension_semantics = [], scalar_prefetch = 0 : i64, scratch_operands = 0 : i64, tpu.core_type = #tpu.core_type<tc>} {
    %c16 = arith.constant 16 : index
    %c0 = arith.constant 0 : index
    %0 = vector.load %arg0[%c16, %c0] : memref<40x128xf32, #tpu.memory_space<vmem>>, vector<5x5xf32>
    %c24 = arith.constant 24 : index
    %c0_0 = arith.constant 0 : index
    %1 = vector.load %arg0[%c24, %c0_0] : memref<40x128xf32, #tpu.memory_space<vmem>>, vector<5x128xf32>
    %c32 = arith.constant 32 : index
    %c0_1 = arith.constant 0 : index
    %2 = vector.load %arg0[%c32, %c0_1] : memref<40x128xf32, #tpu.memory_space<vmem>>, vector<8x128xf32>
    %c0_2 = arith.constant 0 : index
    %c0_3 = arith.constant 0 : index
    %3 = vector.load %arg0[%c0_2, %c0_3] : memref<40x128xf32, #tpu.memory_space<vmem>>, vector<8x5xf32>
    %4 = math.tanh %3 : vector<8x5xf32>
    %cst = arith.constant dense<0.000000e+00> : vector<8x5xf32>
    %5 = tpu.matmul %4, %0, %cst {dimension_numbers = #tpu.dot_dimension_numbers<[1], [0], [0], [1], [0, 0, 1, 1], [], []>} : vector<8x5xf32>, vector<5x5xf32>, vector<8x5xf32> -> vector<8x5xf32>
    %c8 = arith.constant 8 : index
    %c0_4 = arith.constant 0 : index
    %6 = vector.load %arg0[%c8, %c0_4] : memref<40x128xf32, #tpu.memory_space<vmem>>, vector<8x5xf32>
    %7 = arith.addf %6, %5 : vector<8x5xf32>
    %8 = math.tanh %7 : vector<8x5xf32>
    %cst_5 = arith.constant dense<0.000000e+00> : vector<8x128xf32>
    %9 = tpu.matmul %8, %1, %cst_5 {dimension_numbers = #tpu.dot_dimension_numbers<[1], [0], [0], [1], [0, 0, 1, 1], [], []>} : vector<8x5xf32>, vector<5x128xf32>, vector<8x128xf32> -> vector<8x128xf32>
    %10 = arith.addf %9, %2 : vector<8x128xf32>
    %c0_6 = arith.constant 0 : index
    %c0_7 = arith.constant 0 : index
    %11 = vector.load %arg1[%c0_6, %c0_7] : memref<8x128xf32, #tpu.memory_space<vmem>>, vector<8x128xf32>
    tpu.vector_store %arg1[%c0_6, %c0_7], %10 {strides = array<i32>} : memref<8x128xf32, #tpu.memory_space<vmem>>, vector<8x128xf32>,
    return
  }
}

</mosaic_0001>

<bundles_post_ra>
// kernel: tpu_custom_call.1
= control target key start
LH: loop header
LB: loop body
LE: loop exit
PB: predicated region body
PF: predicated region fallthrough
CT: control target
= control target key end

     0   :  { %6 = vsyncpa [#allocation3], 0  ;;  %s189_s0 = inlined_call_operand.hbm [shape: f32[40,128], index: 0, kind: input, shape index: {}]   ;;  %s190_s1 = inlined_call_operand.hbm [shape: f32[8,128], index: 1, kind: output, shape index: {}]  }
   0x1   :  { %7 = vsyncpa [#allocation4], 0  ;;  %s12_s8 = sshll.u32 %s189_s0, 4  ;;  %s169_s9 = smov [#allocation2]   ;;  %s13_s8 = int_to_ptr.hbm [resolvable:$true] %s12_s8 }
   0x2   :  { %s14_s10 = sshll.u32 %s169_s9, 4  ;;  %s170_s11 = smov 128   ;;  %s15_s10 = int_to_ptr.vmem [resolvable:$true] %s14_s10 }
   0x3   :  { %s171_s12 = smov 8  }
   0x4   :  { %20 = dma.hbm_to_vmem [thread:$0]  %s13_s8, 640, %s15_s10, [#allocation3], %s170_s11, %s170_s11, %s171_s12  }
   0x5   :  { %165 = dma.done.wait [#allocation3], 640  }
   0x6   :  { %166 = vsyncadd [#allocation3], 4294966656  ;;  %vm34_vm0 = vcmask 1044480   ;;  %v25_v0 = vld [vmem:[#allocation2 + $0x10] sm:$0x1f]  ;;  %v28_v1 = vld [vmem:[#allocation2] sm:$0xff] }
   0x7   :  { %105 = vmatpush.msk.msra.mxu0 %vm34_vm0, %v25_v0  ;;  %113 = vtanh.f32 %v28_v1  ;;  %vm30_vm1 = vcmask 39936   ;;  %v26_v3 = vld [vmem:[#allocation2 + $0x18] sm:$0x1f]  ;;  %v58_v4 = vld [vmem:[#allocation2 + $0x8] sm:$0xff]  ;;  %v27_v8 = vld [vmem:[#allocation2 + $0x20] sm:$0xff]  ;;  %s172_s0 = smov [#allocation5]  }
   0x8   :  { %107 = vmatpush.msk.msra.mxu1 %vm34_vm0, %v26_v3  ;;  %s93_s13 = sshll.u32 %s172_s0, 4  ;;  %s95_s16 = sshll.u32 %s190_s1, 4  ;;  %s94_s13 = int_to_ptr.vmem [resolvable:$true] %s93_s13  ;;  %s96_s16 = int_to_ptr.hbm [resolvable:$true] %s95_s16 }
   0xd   :  { %v114_v2 = vpop.eup %113 }
   0xe   :  { %106 = vmatmul.msk.f32.vlgmr.msra.gmra.mxu0 %vm30_vm1, %v114_v2 }
  0x8b   :  { %v55_v5 = vpop.f32.mrf.mxu0 }
  0x8c   :  { %v59_v6 = vadd.f32 %v58_v4, %v55_v5 }
  0x8e   :  { %115 = vtanh.f32 %v59_v6 }
  0x94   :  { %v116_v7 = vpop.eup %115 }
  0x95   :  { %108 = vmatmul.msk.f32.vlgmr.msra.gmra.mxu1 %vm30_vm1, %v116_v7 }
 0x112   :  { %v84_v9 = vpop.f32.mrf.mxu1 }
 0x113   :  { %v85_v10 = vadd.f32 %v84_v9, %v27_v8 }
 0x115   :  { %87 = vst [vmem:[#allocation5] sm:$0xff] %v85_v10 }
 0x116   :  { %98 = dma.vmem_to_hbm [thread:$0]  %s94_s13, 128, %s96_s16, [#allocation4]  }
 0x117   :  { %167 = dma.done.wait [#allocation4], 128  }
 0x118   :  { %168 = vsyncadd [#allocation4], 4294967168 }
 0x119   :  { %103 = vsyncpa [#allocation3], 1 }
 0x11a   :  { %104 = vsyncpa [#allocation4], 1 }

</bundles_post_ra>
